<compile_context>
chip_gen: v7x
topology: tpu7x:2x2x1
jax: 0.10.0
libtpu: 0.0.40
codegen_flags: <defaults>
</compile_context>

<pallas_src>
import jax
import jax.numpy as jnp
from jax.experimental import pallas as pl
from jax.experimental.pallas import tpu as pltpu


def _vmem_limit_bytes():
    # Generation-aware scoped-VMEM budget with ~16 MiB headroom
    # (64 MiB physical on v7x, 128 MiB on v5e/v6e).
    try:
        cap = getattr(pltpu.get_tpu_info(), "vmem_capacity_bytes", 64 * 1024 * 1024)
    except Exception:
        cap = 64 * 1024 * 1024
    return max(cap - 16 * 1024 * 1024, 32 * 1024 * 1024)


_VMEM_LIMIT = _vmem_limit_bytes()


# ---------------------------------------------------------------------------
# Pallas kernel 1: dense layer (x @ W + b, tanh) used by the synthetic encoder.
# Row-tiled grid; matmul operands in bf16, f32 accumulation.
# ---------------------------------------------------------------------------
def _dense_tanh_kernel(x_ref, w_ref, b_ref, o_ref):
    acc = jnp.dot(x_ref[...].astype(jnp.bfloat16), w_ref[...],
                  preferred_element_type=jnp.float32)
    o_ref[...] = jnp.tanh(acc + b_ref[...])  # b is (1, N) -> broadcast over rows


def dense_tanh(x, w, b, *, tm=1024):
    """x: [M, K] f32, w: [K, N] f32, b: [1, N] f32 -> [M, N] f32."""
    m, k = x.shape
    n = w.shape[1]
    tm = min(tm, m)
    m_pad = pl.cdiv(m, tm) * tm
    x_p = jnp.pad(x, ((0, m_pad - m), (0, 0))) if m_pad != m else x
    w_bf = w.astype(jnp.bfloat16)  # halves weight DMA bytes / VMEM footprint
    # TODO(synk): single-buffer the resident weight (pipeline_mode=pl.Buffered(1))
    # once confirmed supported on the target jax version; skipped for compile safety.
    out = pl.pallas_call(
        _dense_tanh_kernel,
        out_shape=jax.ShapeDtypeStruct((m_pad, n), jnp.float32),
        grid_spec=pltpu.PrefetchScalarGridSpec(
            num_scalar_prefetch=0,
            grid=(m_pad // tm,),
            in_specs=[
                pl.BlockSpec((tm, k), lambda i: (i, 0)),
                pl.BlockSpec((k, n), lambda i: (0, 0)),   # weight resident across grid
                pl.BlockSpec((1, n), lambda i: (0, 0)),
            ],
            out_specs=pl.BlockSpec((tm, n), lambda i: (i, 0)),
        ),
        compiler_params=pltpu.CompilerParams(
            dimension_semantics=("parallel",),
            vmem_limit_bytes=_VMEM_LIMIT,
        ),
    )(x_p, w_bf, b)
    return out[:m] if m_pad != m else out


# ---------------------------------------------------------------------------
# Pallas kernel 2a: per-batch sentence max-pool.
#   sp_state[n, c*H:(c+1)*H] = max_s mapping[s, n] * h_c[s, :]
# Processed per H-chunk (no [S,4H] VMEM concat); each sentence row is stored
# immediately into an f32 scratch (bounded live ranges, no row concat), then
# one aligned bf16 store emits the block (halves the sp_state HBM round trip).
# ---------------------------------------------------------------------------
def _sp_state_kernel(map_ref, h1_ref, h2_ref, h3_ref, h4_ref, o_ref, acc_ref):
    mapping = map_ref[0]                      # [S, N_pad]
    n_pad = mapping.shape[1]
    hdim = h1_ref.shape[-1]
    # TODO(synk): at real scale (N~64, S~512) use scalar-prefetched per-sentence
    # (start, len) spans to reduce only over each sentence's token slice.
    for c, h_ref in enumerate((h1_ref, h2_ref, h3_ref, h4_ref)):
        state = h_ref[0]                      # [S, H] — one chunk live at a time
        for n in range(n_pad):                # bounded unroll, immediate row stores
            col = mapping[:, n:n + 1]         # [S, 1] static lane slice
            acc_ref[n:n + 1, c * hdim:(c + 1) * hdim] = jnp.max(
                col * state, axis=0, keepdims=True)
    o_ref[...] = acc_ref[...].astype(o_ref.dtype)   # single aligned bf16 store


# ---------------------------------------------------------------------------
# Pallas kernel 2b: batched MLP over all B*N rows, no [M,4H] resident scratch.
# Grid = (M_tiles, Jout_tiles);  h = relu(sp_tile @ W1[:, j] + b1[j]) is
# transient; the partial logit sum(h * w2[j]) accumulates into the lane-dense
# (1, tm) output block, which is resident across the (last) reduction axis.
# ---------------------------------------------------------------------------
def _mlp_kernel(sp_ref, w1_ref, b1_ref, w2_ref, b2_ref, o_ref):
    j = pl.program_id(1)

    @pl.when(j == 0)
    def _():
        o_ref[...] = jnp.full(o_ref.shape, b2_ref[0, 0], dtype=o_ref.dtype)

    h = jnp.dot(sp_ref[...], w1_ref[...], preferred_element_type=jnp.float32)
    h = jnp.maximum(h + b1_ref[...], 0.0)                       # [tm, tj] transient
    # Lane-reduce + per-M-tile relayout to the lane-dense (1, tm) accumulator.
    o_ref[...] += jnp.sum(h * w2_ref[...], axis=-1)[None, :]


def support_logits(all_mapping, h_last4, w1, b1, w2, b2, *, tm=128, tj=512):
    """all_mapping: [B,S,N] f32, h_last4: 4 x [B,S,H] f32 -> sp_logits [B,N,1] f32."""
    B, S, N = all_mapping.shape
    H = h_last4[0].shape[-1]
    D4 = 4 * H

    # Pad the sentence axis to a bf16-tile multiple (16) so each per-batch output
    # block is packed-tile aligned; padded columns are all-zero mapping -> zero rows.
    N_pad = ((N + 15) // 16) * 16
    if N_pad != N:
        all_mapping = jnp.pad(all_mapping, ((0, 0), (0, 0), (0, N_pad - N)))
    M = B * N_pad

    # ---- kernel A: sentence max-pool -> one [B*N_pad, D4] bf16 buffer ----
    sp_state = pl.pallas_call(
        _sp_state_kernel,
        out_shape=jax.ShapeDtypeStruct((M, D4), jnp.bfloat16),
        grid_spec=pltpu.PrefetchScalarGridSpec(
            num_scalar_prefetch=0,
            grid=(B,),
            in_specs=[pl.BlockSpec((1, S, N_pad), lambda b: (b, 0, 0))]
                     + [pl.BlockSpec((1, S, H), lambda b: (b, 0, 0))] * 4,
            out_specs=pl.BlockSpec((N_pad, D4), lambda b: (b, 0)),
            scratch_shapes=[pltpu.VMEM((N_pad, D4), jnp.float32)],
        ),
        compiler_params=pltpu.CompilerParams(
            dimension_semantics=("parallel",),
            vmem_limit_bytes=_VMEM_LIMIT,
        ),
    )(all_mapping, *h_last4)

    # ---- kernel B: batched MLP, (M, Jout)-tiled, no big scratch ----
    tm = min(tm, M)
    m_pad = pl.cdiv(M, tm) * tm
    if m_pad != M:
        sp_state = jnp.pad(sp_state, ((0, m_pad - M), (0, 0)))
    tj = min(tj, D4)
    assert D4 % tj == 0, (D4, tj)

    w1_bf = w1.astype(jnp.bfloat16)
    w2_row = w2.reshape(1, D4)                 # (D4,1) -> (1,D4) for the lane-reduce

    out = pl.pallas_call(
        _mlp_kernel,
        out_shape=jax.ShapeDtypeStruct((1, m_pad), jnp.float32),
        grid_spec=pltpu.PrefetchScalarGridSpec(
            num_scalar_prefetch=0,
            grid=(m_pad // tm, D4 // tj),      # M parallel (v7x 2 TCs), Jout reduction last
            in_specs=[
                pl.BlockSpec((tm, D4), lambda i, j: (i, 0)),   # stays resident over j
                pl.BlockSpec((D4, tj), lambda i, j: (0, j)),
                pl.BlockSpec((1, tj), lambda i, j: (0, j)),
                pl.BlockSpec((1, tj), lambda i, j: (0, j)),
                pl.BlockSpec(memory_space=pltpu.MemorySpace.SMEM),  # b2 scalar
            ],
            out_specs=pl.BlockSpec((1, tm), lambda i, j: (0, i)),
        ),
        compiler_params=pltpu.CompilerParams(
            dimension_semantics=("parallel", "arbitrary"),
            vmem_limit_bytes=_VMEM_LIMIT,
        ),
    )(sp_state, w1_bf, b1, w2_row, b2)

    sp_logits = out[0, :M].reshape(B, N_pad)[:, :N]   # [B, N]
    return sp_logits[..., None]                       # [B, N, 1] to match the module


# ---------------------------------------------------------------------------
# Deterministic parameter construction.
# ---------------------------------------------------------------------------
def make_params(key, vocab, H, S, n_layers):
    D4 = 4 * H
    keys = iter(jax.random.split(key, 12 + 2 * n_layers))
    scale = 0.05
    params = {
        "word_emb": scale * jax.random.normal(next(keys), (vocab, H), jnp.float32),
        "seg_emb": scale * jax.random.normal(next(keys), (2, H), jnp.float32),
        "pos_emb": scale * jax.random.normal(next(keys), (S, H), jnp.float32),
        "layers": [],
        "pool_w": scale * jax.random.normal(next(keys), (H, H), jnp.float32),
        "pool_b": scale * jax.random.normal(next(keys), (1, H), jnp.float32),
        # fc_sf = Linear(4H, 4H) -> ReLU -> Linear(4H, 1)
        "sf_w1": scale * jax.random.normal(next(keys), (D4, D4), jnp.float32),
        "sf_b1": scale * jax.random.normal(next(keys), (1, D4), jnp.float32),
        "sf_w2": scale * jax.random.normal(next(keys), (D4, 1), jnp.float32),
        "sf_b2": scale * jax.random.normal(next(keys), (1, 1), jnp.float32),
    }
    for _ in range(n_layers):
        w = scale * jax.random.normal(next(keys), (H, H), jnp.float32)
        b = scale * jax.random.normal(next(keys), (1, H), jnp.float32)
        params["layers"].append((w, b))
    return params


# ---------------------------------------------------------------------------
# BertSupportNet.forward
# ---------------------------------------------------------------------------
def bert_support_net_forward(params, batch):
    ids = batch["context_idxs"]
    seg = batch["segment_idxs"]
    B, S = ids.shape
    H = params["word_emb"].shape[1]

    # --- synthetic encoder (embeddings + tanh dense layers, Pallas dense) ---
    h = params["word_emb"][ids] + params["seg_emb"][seg] + params["pos_emb"][None, :, :]
    hidden_states = [h]
    for w, b in params["layers"]:
        h = dense_tanh(h.reshape(B * S, H), w, b).reshape(B, S, H)
        hidden_states.append(h)

    # pooled (CLS pooler) is stored for module fidelity but never consumed
    # downstream; plain JAX avoids a sub-(8,128) Pallas block at m=B rows.
    pooled = jnp.tanh(h[:, 0, :] @ params["pool_w"] + params["pool_b"])
    batch["pooled"] = pooled

    # No HBM concat of the last 4 hidden states: they are passed as 4 separate
    # inputs to the support kernel and max-pooled per chunk inside it.
    h_last4 = tuple(hidden_states[-4:])
    batch["context_encoding"] = h_last4

    # --- SupportNet / SimplePredictionLayer (fused Pallas kernels) ---
    sp_logits = support_logits(
        batch["all_mapping"], h_last4,
        params["sf_w1"], params["sf_b1"], params["sf_w2"], params["sf_b2"],
    )
    return sp_logits


# Pure-JAX f32 reference (Precision.HIGHEST) used only to validate the Pallas path.
def reference_forward(params, batch):
    hp = jax.lax.Precision.HIGHEST
    ids = batch["context_idxs"]
    seg = batch["segment_idxs"]
    h = params["word_emb"][ids] + params["seg_emb"][seg] + params["pos_emb"][None, :, :]
    hs = [h]
    for w, b in params["layers"]:
        h = jnp.tanh(jnp.dot(h, w, precision=hp) + b)
        hs.append(h)
    seqout = jnp.concatenate(hs[-4:], axis=-1)
    sp_state = (batch["all_mapping"][..., None] * seqout[:, :, None, :]).max(axis=1)
    h1 = jnp.maximum(jnp.dot(sp_state, params["sf_w1"], precision=hp) + params["sf_b1"], 0.0)
    return jnp.dot(h1, params["sf_w2"], precision=hp) + params["sf_b2"]


if __name__ == "__main__":
    B, S, H, N_SENT, VOCAB, LAYERS = 2, 8, 32, 8, 64, 4

    key = jax.random.PRNGKey(0)
    k_par, k_ids, k_seg, k_map, k_qm = jax.random.split(key, 5)
    params = make_params(k_par, VOCAB, H, S, LAYERS)

    context_idxs = jax.random.randint(k_ids, (B, S), 0, VOCAB, dtype=jnp.int32)
    segment_idxs = jax.random.randint(k_seg, (B, S), 0, 2, dtype=jnp.int32)
    context_mask = jnp.ones((B, S), jnp.float32)
    all_mapping = jax.random.bernoulli(k_map, 0.4, (B, S, N_SENT)).astype(jnp.float32)
    query_mapping = jax.random.bernoulli(k_qm, 0.3, (B, S)).astype(jnp.float32)

    batch = {
        "context_idxs": context_idxs,
        "segment_idxs": segment_idxs,
        "context_mask": context_mask,
        "all_mapping": all_mapping,
        "query_mapping": query_mapping,               # read but unused in forward
        "query_length": jnp.full((B,), 3, jnp.int32),  # read but unused
        "start_position": jnp.zeros((B,), jnp.int32),  # read but unused
        "end_position": jnp.zeros((B,), jnp.int32),    # read but unused
    }

    sp_logits = bert_support_net_forward(params, batch)
    sp_logits = jax.block_until_ready(sp_logits)

    ref = reference_forward(params, batch)
    assert sp_logits.shape == (B, N_SENT, 1), sp_logits.shape
    assert jnp.allclose(sp_logits, ref, atol=5e-3, rtol=5e-3), "mismatch vs reference"

    print("KERNEL_OK")
</pallas_src>

<mosaic_0001>
module attributes {stable_mosaic.version = 11 : i64} {
  func.func @_dense_tanh_kernel(%arg0: i32, %arg1: memref<16x32xf32, #tpu.memory_space<vmem>>, %arg2: memref<32x32xbf16, #tpu.memory_space<vmem>>, %arg3: memref<1x32xf32, #tpu.memory_space<vmem>>, %arg4: memref<16x32xf32, #tpu.memory_space<vmem>>) attributes {dimension_semantics = [#tpu.dimension_semantics<parallel>], iteration_bounds = array<i64: 1>, scalar_prefetch = 0 : i64, scratch_operands = 0 : i64, tpu.core_type = #tpu.core_type<tc>, window_params = [{transform_indices = @transform_0, window_bounds = array<i64: 16, 32>}, {pipeline_mode = #tpu.pipeline_mode<synchronous>, transform_indices = @transform_1, window_bounds = array<i64: 32, 32>}, {pipeline_mode = #tpu.pipeline_mode<synchronous>, transform_indices = @transform_2, window_bounds = array<i64: 1, 32>}, {transform_indices = @transform_3, window_bounds = array<i64: 16, 32>}]} {
    %c0 = arith.constant 0 : index
    %c0_0 = arith.constant 0 : index
    %0 = vector.load %arg1[%c0, %c0_0] : memref<16x32xf32, #tpu.memory_space<vmem>>, vector<16x32xf32>
    %1 = arith.truncf %0 : vector<16x32xf32> to vector<16x32xbf16>
    %c0_1 = arith.constant 0 : index
    %c0_2 = arith.constant 0 : index
    %2 = vector.load %arg2[%c0_1, %c0_2] : memref<32x32xbf16, #tpu.memory_space<vmem>>, vector<32x32xbf16>
    %cst = arith.constant dense<0.000000e+00> : vector<16x32xf32>
    %3 = tpu.matmul %1, %2, %cst {dimension_numbers = #tpu.dot_dimension_numbers<[1], [0], [0], [1], [0, 0, 1, 1], [], []>} : vector<16x32xbf16>, vector<32x32xbf16>, vector<16x32xf32> -> vector<16x32xf32>
    %c0_3 = arith.constant 0 : index
    %c0_4 = arith.constant 0 : index
    %4 = vector.load %arg3[%c0_3, %c0_4] : memref<1x32xf32, #tpu.memory_space<vmem>>, vector<1x32xf32>
    %5 = vector.broadcast %4 : vector<1x32xf32> to vector<16x32xf32>
    %6 = arith.addf %3, %5 : vector<16x32xf32>
    %7 = math.tanh %6 : vector<16x32xf32>
    %c0_5 = arith.constant 0 : index
    %c0_6 = arith.constant 0 : index
    %8 = vector.load %arg4[%c0_5, %c0_6] : memref<16x32xf32, #tpu.memory_space<vmem>>, vector<16x32xf32>
    tpu.vector_store %arg4[%c0_5, %c0_6], %7 {strides = array<i32>} : memref<16x32xf32, #tpu.memory_space<vmem>>, vector<16x32xf32>,
    return
  }
  func.func @transform_0(%arg0: i32) -> (i32, i32) {
    %c0_i32 = arith.constant 0 : i32
    %c0_i32_0 = arith.constant 0 : i32
    return %arg0, %c0_i32 : i32, i32
  }
  func.func @transform_1(%arg0: i32) -> (i32, i32) {
    %c0_i32 = arith.constant 0 : i32
    %c0_i32_0 = arith.constant 0 : i32
    %c0_i32_1 = arith.constant 0 : i32
    return %c0_i32, %c0_i32_0 : i32, i32
  }
  func.func @transform_2(%arg0: i32) -> (i32, i32) {
    %c0_i32 = arith.constant 0 : i32
    %c0_i32_0 = arith.constant 0 : i32
    %c0_i32_1 = arith.constant 0 : i32
    return %c0_i32, %c0_i32_0 : i32, i32
  }
  func.func @transform_3(%arg0: i32) -> (i32, i32) {
    %c0_i32 = arith.constant 0 : i32
    %c0_i32_0 = arith.constant 0 : i32
    return %arg0, %c0_i32 : i32, i32
  }
}

</mosaic_0001>

<bundles_post_ra>
// kernel: tpu_custom_call.1
= control target key start
LH: loop header
LB: loop body
LE: loop exit
PB: predicated region body
PF: predicated region fallthrough
CT: control target
= control target key end

     0   :  { %8 = vsyncpa [#allocation3], 0  ;;  %s316_s0 = inlined_call_operand.hbm [shape: f32[16,32], index: 0, kind: input, shape index: {}]   ;;  %s317_s1 = inlined_call_operand.hbm [shape: bf16[32,32], index: 1, kind: input, shape index: {}]   ;;  %s318_s2 = inlined_call_operand.vmem [shape: f32[1,32], index: 2, kind: input, shape index: {}]   ;;  %s319_s3 = inlined_call_operand.hbm [shape: f32[16,32], index: 3, kind: output, shape index: {}]  }
   0x1   :  { %9 = vsyncpa [#allocation6], 0 }
   0x2   :  { %10 = vsyncpa [#allocation4], 0  ;;  %s239_s12 = smov [#allocation2]   ;;  %s167_s16 = scalar_lea.hbm %s316_s0, 256 }
   0x3   :  { %s16_s13 = sshll.u32 %s239_s12, 4  ;;  %p168_p0 = scmp.ne.s32.totalorder %s316_s0, %s167_s16  ;;  %s17_s13 = int_to_ptr.vmem [resolvable:$true] %s16_s13 }
   0x4   :  { %p171_p1 = scmp.lt.u32.totalorder %s167_s16, %s316_s0 }
   0x6   :  { %p173_p2 = pnand %p171_p1, %p168_p0 }
   0x8   :  { %176 = shalt.err (!%p173_p2)
}
   0x9   :  { %s177_s21 = scalar_lea.vmem %s17_s13, 256  ;;  %p182_p4 = scmp.lt.s32.totalorder %s17_s13, %s17_s13 }
   0xa   :  { %p178_p3 = scmp.ne.s32.totalorder %s17_s13, %s177_s21  ;;  %p183_p5 = scmp.lt.s32.totalorder %s177_s21, %s177_s21 }
   0xc   :  { %p184_p6 = por %p183_p5, %p182_p4 }
   0xe   :  { %p185_p7 = pnand %p184_p6, %p178_p3 }
  0x10   :  { %188 = shalt.err (!%p185_p7)
}
  0x11   :  { %s240_s22 = smov 128   ;;  %s241_s23 = smov 8  }
  0x12   :  { %22 = dma.hbm_to_vmem [thread:$0]  %s316_s0, 256, %s17_s13, [#allocation3], %s240_s22, %s240_s22, %s241_s23  }
  0x13   :  { %s242_s26 = smov [#allocation5]   ;;  %s189_s30 = scalar_lea.hbm %s317_s1, 256 }
  0x14   :  { %s28_s27 = sshll.u32 %s242_s26, 4  ;;  %p190_p8 = scmp.ne.s32.totalorder %s317_s1, %s189_s30  ;;  %s29_s27 = int_to_ptr.vmem [resolvable:$true] %s28_s27 }
  0x15   :  { %p193_p9 = scmp.lt.u32.totalorder %s189_s30, %s317_s1 }
  0x17   :  { %p195_p10 = pnand %p193_p9, %p190_p8 }
  0x19   :  { %198 = shalt.err (!%p195_p10)
}
  0x1a   :  { %s199_s8 = scalar_lea.vmem %s29_s27, 256  ;;  %p204_p12 = scmp.lt.s32.totalorder %s29_s27, %s29_s27 }
  0x1b   :  { %p200_p11 = scmp.ne.s32.totalorder %s29_s27, %s199_s8  ;;  %p205_p13 = scmp.lt.s32.totalorder %s199_s8, %s199_s8 }
  0x1d   :  { %p206_p0 = por %p205_p13, %p204_p12 }
  0x1f   :  { %p207_p1 = pnand %p206_p0, %p200_p11 }
  0x21   :  { %210 = shalt.err (!%p207_p1)
}
  0x22   :  { %s243_s0 = smov 64   ;;  %s244_s9 = smov 4  }
  0x23   :  { %34 = dma.hbm_to_vmem [thread:$0]  %s317_s1, 256, %s29_s27, [#allocation6], %s243_s0, %s243_s0, %s244_s9  }
  0x24   :  { %233 = dma.done.wait [#allocation3], 256  }
  0x25   :  { %234 = vsyncadd [#allocation3], 4294967040 }
  0x26   :  { %235 = dma.done.wait [#allocation6], 256  }
  0x27   :  { %236 = vsyncadd [#allocation6], 4294967040  ;;  %v245_v0 = vmov 0.0   ;;  %vm246_vm0 = vmmov 0   ;;  %v161_v1 = vld [vmem:[#allocation5] sm:$0xff]   ;;  %v162_v2 = vld [vmem:[#allocation5 + $0x8] sm:$0xff]  }
  0x28   :  { %144 = vmatprep.subr.bf16.mxu0 %v245_v0  ;;  %148 = vmatprep.mubr.msk.bf16.mxu0 %vm246_vm0, %v245_v0  ;;  %v44_v3 = vld [vmem:[#allocation2] sm:$0xff]  ;;  %v45_v4 = vld [vmem:[#allocation2 + $0x8] sm:$0xff]  ;;  %vm70_vm1 = vcmask 261120   ;;  %s247_s13 = smov [#allocation7]  }
  0x29   :  { %145 = vmatpush3.bf16.msra.mxu0 %v161_v1  ;;  %v46_v5 = vpack.c.bf16 %v45_v4, %v44_v3  ;;  %v137_v6 = vld [vmem:[%s318_s2] ss:$0 sm:$0xff]  ;;  %s124_s14 = sshll.u32 %s247_s13, 4  ;;  %s125_s14 = int_to_ptr.vmem [resolvable:$true] %s124_s14 }
  0x2a   :  { %146 = vmatprep.subr.bf16.mxu0 %v245_v0  ;;  %s211_s15 = scalar_lea.vmem %s125_s14, 256  ;;  %p216_p3 = scmp.lt.s32.totalorder %s125_s14, %s125_s14 }
  0x2b   :  { %p212_p2 = scmp.ne.s32.totalorder %s125_s14, %s211_s15  ;;  %p217_p4 = scmp.lt.s32.totalorder %s211_s15, %s211_s15 }
  0x2d   :  { %147 = vmatpush3.bf16.msra.mxu0 %v162_v2  ;;  %p218_p5 = por %p217_p4, %p216_p3 }
  0x2f   :  { %p219_p6 = pnand %p218_p5, %p212_p2 }
  0x30   :  { %149 = vmatmul.mubr.msk.bf16.vlgmr.msra.gmra.mrb[0].mxu0 %vm70_vm1, %v46_v5 }
 0x103   :  { %v108_v7 = vpop.f32.mrb[0].mxu0 }
 0x104   :  { %v109_v8 = vadd.f32 %v137_v6, %v108_v7  ;;  %v150_v9 = vpop.f32.mrb[1].mxu0 }
 0x105   :  { %v111_v10 = vpop.f32.mrb[2].mxu0 }
 0x106   :  { %163 = vtanh.f32 %v109_v8  ;;  %v112_v11 = vadd.f32 %v137_v6, %v111_v10  ;;  %v151_v12 = vpop.f32.mrb[3].mxu0 }
 0x108   :  { %165 = vtanh.f32 %v112_v11 }
 0x110   :  { %v164_v13 = vpop.eup %163 }
 0x111   :  { %117 = vst.msk [vmem:[#allocation7] sm:$0xff] %vm70_vm1, %v164_v13 }
 0x112   :  { %v166_v14 = vpop.eup %165 }
 0x113   :  { %118 = vst.msk [vmem:[#allocation7 + $0x8] sm:$0xff] %vm70_vm1, %v166_v14 }
 0x114   :  { %222 = shalt.err (!%p219_p6)
}
 0x115   :  { %s223_s17 = scalar_lea.hbm %s319_s3, 256 }
 0x116   :  { %p224_p7 = scmp.ne.s32.totalorder %s319_s3, %s223_s17  ;;  %p227_p8 = scmp.lt.u32.totalorder %s223_s17, %s319_s3 }
 0x118   :  { %p229_p9 = pnand %p227_p8, %p224_p7 }
 0x11a   :  { %232 = shalt.err (!%p229_p9)
}
 0x11b   :  { %130 = dma.vmem_to_hbm [thread:$0]  %s125_s14, 256, %s319_s3, [#allocation4], %s240_s22, %s240_s22, %s241_s23  }
 0x11c   :  { %237 = dma.done.wait [#allocation4], 256  }
 0x11d   :  { %238 = vsyncadd [#allocation4], 4294967040 }
 0x11e   :  { %134 = vsyncpa [#allocation3], 1 }
 0x11f   :  { %135 = vsyncpa [#allocation6], 1 }
 0x120   :  { %136 = vsyncpa [#allocation4], 1 }

</bundles_post_ra>
